<compile_context>
chip_gen: v6e
topology: v6e:2x2x1
jax: 0.10.0
libtpu: 0.0.40
codegen_flags: <defaults>
</compile_context>

<pallas_src>
import math

import jax
import jax.numpy as jnp
from jax.experimental import pallas as pl
from jax.experimental.pallas import tpu as pltpu


def _round_up(x, m):
    return ((x + m - 1) // m) * m


def _classifier_head_kernel(cls_ref, wp_ref, bp_ref, wc_ref, bc_ref, out_ref):
    # cls_ref: (Bt, H)  bf16    wp_ref: (H, H)  bf16    bp_ref: (1, H)  f32
    # wc_ref:  (H, Cp)  bf16    bc_ref: (1, Cp) f32     out_ref: (Bt, Cp) f32
    pooled = jnp.dot(cls_ref[...], wp_ref[...],
                     preferred_element_type=jnp.float32) + bp_ref[...]
    # tanh-approximate GELU: transcendental goes to the EUP slot instead of a
    # long erf VALU polynomial (VALU is the binding slot at large B on v6e/v7x).
    # Deviation from PyTorch's exact erf GELU is far below the bf16 tolerance.
    act = jax.nn.gelu(pooled, approximate=True)
    # dr_rate == 0.0 in this config -> dropout is a no-op (matches `if self.dr_rate:`).
    # TODO(synk): add stochastic dropout via pltpu.prng_random_bits if dr_rate > 0.
    logits = jnp.dot(act.astype(jnp.bfloat16), wc_ref[...],
                     preferred_element_type=jnp.float32) + bc_ref[...]
    out_ref[...] = logits.astype(out_ref.dtype)


def pack_classifier_params(wp, bp, wc, bc):
    """One-time weight pre-pack. Call at model load, NOT per forward pass.

    wp: (H, H) pooler.weight (PyTorch (out, in) layout), bp: (H,) pooler.bias.
    wc: (C, H) classifier.weight (PyTorch layout),       bc: (C,) classifier.bias.
    Returns (wp_t, bp_p, wc_t, bc_p) with bf16 MXU weights, (in -> out) layout,
    and the classifier lane dim zero-padded to a 128 multiple (unmasked stores).
    """
    H = wp.shape[0]
    C = wc.shape[0]
    c_pad = pl.cdiv(C, 128) * 128
    wp_t = jnp.asarray(wp).T.astype(jnp.bfloat16)                       # (H, H)
    wc_t = jnp.pad(jnp.asarray(wc).T.astype(jnp.bfloat16),
                   ((0, 0), (0, c_pad - C)))                            # (H, Cp)
    bp_p = jnp.asarray(bp, jnp.float32).reshape(1, H)                   # (1, H)
    bc_p = jnp.pad(jnp.asarray(bc, jnp.float32),
                   (0, c_pad - C)).reshape(1, c_pad)                    # (1, Cp)
    return wp_t, bp_p, wc_t, bc_p


def _default_b_tile(B):
    if B >= 1024:
        # v6e: fewer grid steps (~0.35 us each); still >= 2 tiles for v7x megacore.
        return 512
    if B > 8:
        # >= 2 tiles so both v7x TensorCores get work; sublane-aligned, cap 256.
        return min(256, _round_up(pl.cdiv(B, 2), 8))
    return B  # tiny batch: full-dim block


def koelectra_classifier_head(hidden_states, packed, num_classes, *, b_tile=None):
    """KoELECTRA classification head.

    hidden_states: (B, S, H) backbone sequence output.
    packed: output of pack_classifier_params (pre-transposed / bf16 / padded).
    Returns float32 logits of shape (B, num_classes).
    """
    B, S, H = hidden_states.shape
    wp_t, bp_p, wc_t, bc_p = packed
    c_pad = wc_t.shape[1]
    C = num_classes

    # CLS-only slice, cast to bf16 in the wrapper: only B*H*2 bytes ever stream
    # through the kernel DMA once the weights are VMEM-resident.
    cls = hidden_states[:, 0, :].astype(jnp.bfloat16)                   # (B, H)

    if b_tile is None:
        b_tile = _default_b_tile(B)
    grid = (pl.cdiv(B, b_tile),)
    # Note: if B % b_tile != 0, the final tile's out-of-range rows hold
    # unspecified data; rows are independent and those outputs are sliced away.

    cost = pl.CostEstimate(
        flops=2 * B * H * (H + c_pad),
        transcendentals=B * H,
        bytes_accessed=(wp_t.size * 2 + wc_t.size * 2
                        + bp_p.size * 4 + bc_p.size * 4
                        + B * H * 2 + B * c_pad * 4),
    )

    out = pl.pallas_call(
        _classifier_head_kernel,
        out_shape=jax.ShapeDtypeStruct((B, c_pad), jnp.float32),
        grid_spec=pltpu.PrefetchScalarGridSpec(
            num_scalar_prefetch=0,
            grid=grid,
            in_specs=[
                pl.BlockSpec((b_tile, H), lambda i: (i, 0)),    # CLS tile (streams)
                pl.BlockSpec((H, H), lambda i: (0, 0)),         # pooler W (resident)
                pl.BlockSpec((1, H), lambda i: (0, 0)),         # pooler b (resident)
                pl.BlockSpec((H, c_pad), lambda i: (0, 0)),     # classifier W (resident)
                pl.BlockSpec((1, c_pad), lambda i: (0, 0)),     # classifier b (resident)
            ],
            out_specs=pl.BlockSpec((b_tile, c_pad), lambda i: (i, 0)),
        ),
        compiler_params=pltpu.CompilerParams(
            dimension_semantics=("parallel",)),
        cost_estimate=cost,
    )(cls, wp_t, bp_p, wc_t, bc_p)

    return out[:, :C]


def _xavier_uniform(key, fan_out, fan_in, dtype=jnp.float32):
    # torch.nn.init.xavier_uniform_ on a (fan_out, fan_in) Linear weight.
    bound = math.sqrt(6.0 / (fan_in + fan_out))
    return jax.random.uniform(key, (fan_out, fan_in), dtype, -bound, bound)


def _linear_bias(key, fan_in, fan_out, dtype=jnp.float32):
    # PyTorch nn.Linear default bias init: U(-1/sqrt(fan_in), 1/sqrt(fan_in)).
    bound = 1.0 / math.sqrt(fan_in)
    return jax.random.uniform(key, (fan_out,), dtype, -bound, bound)


if __name__ == "__main__":
    # Small shapes consistent with the forward pass.
    B, S, H, C = 2, 8, 32, 3

    key = jax.random.PRNGKey(0)
    k_hidden, k_wp, k_bp, k_wc, k_bc = jax.random.split(key, 5)

    # Stand-in for electra(...)[0]: the backbone is external to this module.
    hidden_states = jax.random.normal(k_hidden, (B, S, H), jnp.float32)

    # Parameters in PyTorch Linear layout (out, in).
    wp = _xavier_uniform(k_wp, H, H)          # pooler.weight     (H, H)
    bp = _linear_bias(k_bp, H, H)             # pooler.bias       (H,)
    wc = _xavier_uniform(k_wc, C, H)          # classifier.weight (C, H)
    bc = _linear_bias(k_bc, H, C)             # classifier.bias   (C,)

    # One-time pre-pack (model-load time), NOT part of the per-call hot path.
    packed = jax.block_until_ready(pack_classifier_params(wp, bp, wc, bc))

    logits = koelectra_classifier_head(hidden_states, packed, C)
    logits = jax.block_until_ready(logits)
    assert logits.shape == (B, C)

    # Pure-JAX f32 reference (exact erf GELU); kernel uses bf16 MXU operands
    # (f32 accumulation) and tanh GELU, so compare at bf16-appropriate tolerance.
    cls_ref = hidden_states[:, 0, :]
    ref = jax.nn.gelu(cls_ref @ wp.T + bp, approximate=False) @ wc.T + bc
    assert jnp.allclose(logits, ref, atol=5e-2, rtol=5e-2), "mismatch vs reference"

    print("KERNEL_OK")
</pallas_src>

<mosaic_0001>
module attributes {stable_mosaic.version = 11 : i64} {
  func.func @_classifier_head_kernel(%arg0: i32, %arg1: memref<2x32xbf16, #tpu.memory_space<vmem>>, %arg2: memref<32x32xbf16, #tpu.memory_space<vmem>>, %arg3: memref<1x32xf32, #tpu.memory_space<vmem>>, %arg4: memref<32x128xbf16, #tpu.memory_space<vmem>>, %arg5: memref<1x128xf32, #tpu.memory_space<vmem>>, %arg6: memref<2x128xf32, #tpu.memory_space<vmem>>) attributes {dimension_semantics = [#tpu.dimension_semantics<parallel>], iteration_bounds = array<i64: 1>, scalar_prefetch = 0 : i64, scratch_operands = 0 : i64, tpu.core_type = #tpu.core_type<tc>, window_params = [{transform_indices = @transform_0, window_bounds = array<i64: 2, 32>}, {pipeline_mode = #tpu.pipeline_mode<synchronous>, transform_indices = @transform_1, window_bounds = array<i64: 32, 32>}, {pipeline_mode = #tpu.pipeline_mode<synchronous>, transform_indices = @transform_2, window_bounds = array<i64: 1, 32>}, {pipeline_mode = #tpu.pipeline_mode<synchronous>, transform_indices = @transform_3, window_bounds = array<i64: 32, 128>}, {pipeline_mode = #tpu.pipeline_mode<synchronous>, transform_indices = @transform_4, window_bounds = array<i64: 1, 128>}, {transform_indices = @transform_5, window_bounds = array<i64: 2, 128>}]} {
    %c0 = arith.constant 0 : index
    %c0_0 = arith.constant 0 : index
    %0 = vector.load %arg1[%c0, %c0_0] : memref<2x32xbf16, #tpu.memory_space<vmem>>, vector<2x32xbf16>
    %c0_1 = arith.constant 0 : index
    %c0_2 = arith.constant 0 : index
    %1 = vector.load %arg2[%c0_1, %c0_2] : memref<32x32xbf16, #tpu.memory_space<vmem>>, vector<32x32xbf16>
    %cst = arith.constant dense<0.000000e+00> : vector<2x32xf32>
    %2 = tpu.matmul %0, %1, %cst {dimension_numbers = #tpu.dot_dimension_numbers<[1], [0], [0], [1], [0, 0, 1, 1], [], []>} : vector<2x32xbf16>, vector<32x32xbf16>, vector<2x32xf32> -> vector<2x32xf32>
    %c0_3 = arith.constant 0 : index
    %c0_4 = arith.constant 0 : index
    %3 = vector.load %arg3[%c0_3, %c0_4] : memref<1x32xf32, #tpu.memory_space<vmem>>, vector<1x32xf32>
    %4 = vector.broadcast %3 : vector<1x32xf32> to vector<2x32xf32>
    %5 = arith.addf %2, %4 : vector<2x32xf32>
    %6 = arith.mulf %5, %5 : vector<2x32xf32>
    %7 = arith.mulf %5, %6 : vector<2x32xf32>
    %cst_5 = arith.constant 4.471500e-02 : f32
    %8 = vector.broadcast %cst_5 : f32 to vector<2x32xf32>
    %9 = arith.mulf %8, %7 : vector<2x32xf32>
    %10 = arith.addf %5, %9 : vector<2x32xf32>
    %cst_6 = arith.constant 0.797884583 : f32
    %11 = vector.broadcast %cst_6 : f32 to vector<2x32xf32>
    %12 = arith.mulf %11, %10 : vector<2x32xf32>
    %13 = math.tanh %12 : vector<2x32xf32>
    %cst_7 = arith.constant 1.000000e+00 : f32
    %14 = vector.broadcast %cst_7 : f32 to vector<2x32xf32>
    %15 = arith.addf %14, %13 : vector<2x32xf32>
    %cst_8 = arith.constant 5.000000e-01 : f32
    %16 = vector.broadcast %cst_8 : f32 to vector<2x32xf32>
    %17 = arith.mulf %16, %15 : vector<2x32xf32>
    %18 = arith.mulf %5, %17 : vector<2x32xf32>
    %19 = arith.truncf %18 : vector<2x32xf32> to vector<2x32xbf16>
    %c0_9 = arith.constant 0 : index
    %c0_10 = arith.constant 0 : index
    %20 = vector.load %arg4[%c0_9, %c0_10] : memref<32x128xbf16, #tpu.memory_space<vmem>>, vector<32x128xbf16>
    %cst_11 = arith.constant dense<0.000000e+00> : vector<2x128xf32>
    %21 = tpu.matmul %19, %20, %cst_11 {dimension_numbers = #tpu.dot_dimension_numbers<[1], [0], [0], [1], [0, 0, 1, 1], [], []>} : vector<2x32xbf16>, vector<32x128xbf16>, vector<2x128xf32> -> vector<2x128xf32>
    %c0_12 = arith.constant 0 : index
    %c0_13 = arith.constant 0 : index
    %22 = vector.load %arg5[%c0_12, %c0_13] : memref<1x128xf32, #tpu.memory_space<vmem>>, vector<1x128xf32>
    %23 = vector.broadcast %22 : vector<1x128xf32> to vector<2x128xf32>
    %24 = arith.addf %21, %23 : vector<2x128xf32>
    %c0_14 = arith.constant 0 : index
    %c0_15 = arith.constant 0 : index
    %25 = vector.load %arg6[%c0_14, %c0_15] : memref<2x128xf32, #tpu.memory_space<vmem>>, vector<2x128xf32>
    tpu.vector_store %arg6[%c0_14, %c0_15], %24 {strides = array<i32>} : memref<2x128xf32, #tpu.memory_space<vmem>>, vector<2x128xf32>,
    return
  }
  func.func @transform_0(%arg0: i32) -> (i32, i32) {
    %c0_i32 = arith.constant 0 : i32
    %c0_i32_0 = arith.constant 0 : i32
    return %arg0, %c0_i32 : i32, i32
  }
  func.func @transform_1(%arg0: i32) -> (i32, i32) {
    %c0_i32 = arith.constant 0 : i32
    %c0_i32_0 = arith.constant 0 : i32
    %c0_i32_1 = arith.constant 0 : i32
    return %c0_i32, %c0_i32_0 : i32, i32
  }
  func.func @transform_2(%arg0: i32) -> (i32, i32) {
    %c0_i32 = arith.constant 0 : i32
    %c0_i32_0 = arith.constant 0 : i32
    %c0_i32_1 = arith.constant 0 : i32
    return %c0_i32, %c0_i32_0 : i32, i32
  }
  func.func @transform_3(%arg0: i32) -> (i32, i32) {
    %c0_i32 = arith.constant 0 : i32
    %c0_i32_0 = arith.constant 0 : i32
    %c0_i32_1 = arith.constant 0 : i32
    return %c0_i32, %c0_i32_0 : i32, i32
  }
  func.func @transform_4(%arg0: i32) -> (i32, i32) {
    %c0_i32 = arith.constant 0 : i32
    %c0_i32_0 = arith.constant 0 : i32
    %c0_i32_1 = arith.constant 0 : i32
    return %c0_i32, %c0_i32_0 : i32, i32
  }
  func.func @transform_5(%arg0: i32) -> (i32, i32) {
    %c0_i32 = arith.constant 0 : i32
    %c0_i32_0 = arith.constant 0 : i32
    return %arg0, %c0_i32 : i32, i32
  }
}

</mosaic_0001>

<bundles_post_ra>
// kernel: tpu_custom_call.1
= control target key start
LH: loop header
LB: loop body
LE: loop exit
PB: predicated region body
PF: predicated region fallthrough
CT: control target
= control target key end

     0   :  { %10 = vsyncpa [#allocation3], 0  ;;  %s410_s0 = inlined_call_operand.hbm [shape: bf16[2,32], index: 0, kind: input, shape index: {}]   ;;  %s411_s1 = inlined_call_operand.hbm [shape: bf16[32,32], index: 1, kind: input, shape index: {}]   ;;  %s412_s2 = inlined_call_operand.vmem [shape: f32[1,32], index: 2, kind: input, shape index: {}]   ;;  %s413_s3 = inlined_call_operand.hbm [shape: bf16[32,128], index: 3, kind: input, shape index: {}]   ;;  %s414_s4 = inlined_call_operand.vmem [shape: f32[1,128], index: 4, kind: input, shape index: {}]   ;;  %s415_s5 = inlined_call_operand.hbm [shape: f32[2,128], index: 5, kind: output, shape index: {}]  }
   0x1   :  { %11 = vsyncpa [#allocation6], 0 }
   0x2   :  { %12 = vsyncpa [#allocation4], 0  ;;  %s352_s18 = smov [#allocation5]  }
   0x3   :  { %s28_s19 = sshll.u32 %s352_s18, 4  ;;  %s29_s19 = int_to_ptr.vmem [resolvable:$true] %s28_s19 }
   0x4   :  { %s274_s20 = scalar_lea.vmem %s29_s19, 256  ;;  %p279_p1 = scmp.lt.s32.totalorder %s29_s19, %s29_s19 }
   0x5   :  { %p275_p0 = scmp.ne.s32.totalorder %s29_s19, %s274_s20  ;;  %p280_p2 = scmp.lt.s32.totalorder %s274_s20, %s274_s20 }
   0x7   :  { %p281_p3 = por %p280_p2, %p279_p1 }
   0x9   :  { %p282_p4 = pnand %p281_p3, %p275_p0 }
   0xb   :  { %285 = shalt.err (!%p282_p4)
}
   0xc   :  { %s353_s21 = smov 64   ;;  %s354_s22 = smov 4  }
   0xd   :  { %34 = dma.hbm_to_vmem [thread:$0]  %s411_s1, 256, %s29_s19, [#allocation6], %s353_s21, %s353_s21, %s354_s22  }
   0xe   :  { %s355_s25 = smov [#allocation2]   ;;  %s356_s27 = smov [#allocation7]  }
   0xf   :  { %s19_s26 = sshll.u32 %s355_s25, 4  ;;  %s42_s28 = sshll.u32 %s356_s27, 4  ;;  %s20_s26 = int_to_ptr.vmem [resolvable:$true] %s19_s26  ;;  %s43_s28 = int_to_ptr.vmem [resolvable:$true] %s42_s28 }
  0x10   :  { %s294_s29 = scalar_lea.vmem %s20_s26, 16  ;;  %s298_s30 = scalar_lea.vmem %s20_s26, 32 }
  0x11   :  { %p295_p5 = scmp.ne.s32.totalorder %s20_s26, %s294_s29  ;;  %p299_p6 = scmp.lt.s32.totalorder %s20_s26, %s20_s26 }
  0x12   :  { %p300_p7 = scmp.lt.s32.totalorder %s298_s30, %s294_s29 }
  0x14   :  { %p301_p8 = por %p300_p7, %p299_p6 }
  0x16   :  { %p302_p9 = pnand %p301_p8, %p295_p5 }
  0x18   :  { %305 = shalt.err (!%p302_p9)
}
  0x19   :  { %22 = dma.hbm_to_vmem [thread:$0]  %s410_s0, 16, %s20_s26, [#allocation3]  }
  0x1a   :  { %s314_s8 = scalar_lea.vmem %s43_s28, 256  ;;  %p319_p11 = scmp.lt.s32.totalorder %s43_s28, %s43_s28 }
  0x1b   :  { %p315_p10 = scmp.ne.s32.totalorder %s43_s28, %s314_s8  ;;  %p320_p12 = scmp.lt.s32.totalorder %s314_s8, %s314_s8 }
  0x1d   :  { %p321_p13 = por %p320_p12, %p319_p11 }
  0x1f   :  { %p322_p0 = pnand %p321_p13, %p315_p10 }
  0x21   :  { %325 = shalt.err (!%p322_p0)
}
  0x22   :  { %48 = dma.hbm_to_vmem [thread:$0]  %s413_s3, 256, %s43_s28, [#allocation6], %s353_s21, %s353_s21, %s354_s22  }
  0x23   :  { %346 = dma.done.wait [#allocation3], 16  }
  0x24   :  { %347 = vsyncadd [#allocation3], 4294967280 }
  0x25   :  { %348 = dma.done.wait [#allocation6], 512  }
  0x26   :  { %349 = vsyncadd [#allocation6], 4294966784  ;;  %v357_v0 = vmov 0.0   ;;  %vm358_vm0 = vmmov 0   ;;  %v260_v1 = vld [vmem:[#allocation5 + $0x8] sm:$0xff]   ;;  %v261_v2 = vld [vmem:[#allocation5] sm:$0xff]  }
  0x27   :  { %236 = vmatprep.subr.bf16.mxu0 %v357_v0  ;;  %240 = vmatprep.mubr.msk.bf16.mxu0 %vm358_vm0, %v357_v0  ;;  %v61_v3 = vld [vmem:[#allocation2] sm:$0x1]  ;;  %vm85_vm1 = vcmask 261120   ;;  %v263_v5 = vld [vmem:[#allocation7] sm:$0xff]   ;;  %s359_s11 = smov [#allocation8]  }
  0x28   :  { %244 = vmatprep.subr.bf16.mxu1 %v357_v0  ;;  %248 = vmatprep.mubr.msk.bf16.mxu1 %vm358_vm0, %v357_v0  ;;  %v262_v4 = vld [vmem:[#allocation7 + $0x8] sm:$0xff]   ;;  %s212_s12 = sshll.u32 %s359_s11, 4  ;;  %s213_s12 = int_to_ptr.vmem [resolvable:$true] %s212_s12 }
  0x29   :  { %237 = vmatpush3.bf16.msra.mxu0 %v260_v1  ;;  %245 = vmatpush3.bf16.msra.mxu1 %v262_v4  ;;  %v222_v6 = vld [vmem:[%s412_s2] ss:$0 sm:$0xff]  ;;  %s326_s13 = scalar_lea.vmem %s213_s12, 32  ;;  %p331_p2 = scmp.lt.s32.totalorder %s213_s12, %s213_s12 }
  0x2a   :  { %238 = vmatprep.subr.bf16.mxu0 %v357_v0  ;;  %246 = vmatprep.subr.bf16.mxu1 %v357_v0  ;;  %v226_v22 = vld [vmem:[%s414_s4] ss:$0 sm:$0xff]  ;;  %p327_p1 = scmp.ne.s32.totalorder %s213_s12, %s326_s13  ;;  %p332_p3 = scmp.lt.s32.totalorder %s326_s13, %s326_s13 }
  0x2c   :  { %p333_p4 = por %p332_p3, %p331_p2 }
  0x2d   :  { %239 = vmatpush3.bf16.msra.mxu0 %v261_v2  ;;  %247 = vmatpush3.bf16.msra.mxu1 %v263_v5 }
  0x2e   :  { %p334_p5 = pnand %p333_p4, %p327_p1 }
  0x30   :  { %241 = vmatmul.mubr.msk.bf16.vlgmr.msra.gmra.mxu0 %vm85_vm1, %v61_v3 }
  0xf0   :  { %v123_v7 = vpop.f32.mrf.mxu0 }
  0xf1   :  { %v124_v8 = vadd.f32 %v222_v6, %v123_v7 }
  0xf2   :  { %v242_v9 = vpop.f32.mrf.mxu0 }
  0xf3   :  { %v129_v10 = vmul.f32 %v124_v8, %v124_v8 }
  0xf4   :  { %v126_v11 = vpop.f32.mrf.mxu0 }
  0xf5   :  { %v130_v12 = vmul.f32 %v129_v10, %v124_v8 }
  0xf6   :  { %v243_v13 = vpop.f32.mrf.mxu0 }
  0xf7   :  { %v131_v14 = vmul.f32 0.044715, %v130_v12 }
  0xf9   :  { %v132_v15 = vadd.f32 %v131_v14, %v124_v8 }
  0xfb   :  { %v133_v16 = vmul.f32 0.7978846, %v132_v15 }
  0xfd   :  { %264 = vtanh.f32 %v133_v16 }
 0x10a   :  { %v265_v17 = vpop.eup %264 }
 0x10b   :  { %v135_v18 = vadd.f32 1.0, %v265_v17 }
 0x10d   :  { %v136_v19 = vmul.f32 0.5, %v135_v18 }
 0x10f   :  { %v137_v20 = vmul.f32 %v136_v19, %v124_v8 }
 0x111   :  { %v138_v21 = vpack.c.bf16 %v137_v20, %v137_v20 }
 0x113   :  { %249 = vmatmul.mubr.msk.bf16.vlgmr.msra.gmra.mxu1 %vm85_vm1, %v138_v21 }
 0x1d3   :  { %v199_v23 = vpop.f32.mrf.mxu1 }
 0x1d4   :  { %v200_v24 = vadd.f32 %v226_v22, %v199_v23 }
 0x1d5   :  { %v250_v25 = vpop.f32.mrf.mxu1 }
 0x1d6   :  { %205 = vst [vmem:[#allocation8] sm:$0x3] %v200_v24 }
 0x1d7   :  { %v202_v26 = vpop.f32.mrf.mxu1 }
 0x1d8   :  { %337 = shalt.err (!%p334_p5)
}
 0x1d9   :  { %215 = dma.vmem_to_hbm [thread:$0]  %s213_s12, 32, %s415_s5, [#allocation4]   ;;  %v251_v27 = vpop.f32.mrf.mxu1 }
 0x1da   :  { %350 = dma.done.wait [#allocation4], 32  }
 0x1db   :  { %351 = vsyncadd [#allocation4], 4294967264 }
 0x1dc   :  { %219 = vsyncpa [#allocation3], 1 }
 0x1dd   :  { %220 = vsyncpa [#allocation6], 1 }
 0x1de   :  { %221 = vsyncpa [#allocation4], 1 }

</bundles_post_ra>
